<compile_context>
chip_gen: v6e
topology: v6e:2x2x1
jax: 0.10.0
libtpu: 0.0.40
codegen_flags: <defaults>
</compile_context>

<pallas_src>
import functools

import jax
import jax.numpy as jnp
from jax.experimental import pallas as pl
from jax.experimental.pallas import tpu as pltpu

_NOISE_STD = 1e-5  # matches the 1e-5 * torch.randn(...) of the original module


# ----------------------------------------------------------------------------
# Pallas kernels
# ----------------------------------------------------------------------------
def _self_attention_full_kernel(x_ref, w_ref, o_ref, *, seq_len, hidden):
    """Full path (mean_only=False).

    x_ref: (BB, T, H)   inputs tile (BB batch rows)
    w_ref: (1, H)       attention weight vector
    o_ref: (BB, 2H)     [avg | std] per batch row
    """
    x = x_ref[...].astype(jnp.float32)                     # (BB, T, H)
    w = w_ref[...].astype(jnp.float32)                     # (1, H)

    # attention scores: VPU multiply + lane reduce (avoid masked N=1 MXU matmul)
    s = jnp.sum(x * w[None], axis=-1, keepdims=True)       # (BB, T, 1)
    t = jnp.tanh(s)                                        # EUP

    # softmax over the sequence axis (dim=1 in the PyTorch module)
    m = jnp.max(t, axis=1, keepdims=True)
    p = jnp.exp(t - m)
    denom = jnp.sum(p, axis=1, keepdims=True)
    a = p * pl.reciprocal(denom, approx=True)              # (BB, T, 1)

    weighted = x * a                                       # (BB, T, H)

    # single pass: sum and sum-of-squares over T
    sum_w = jnp.sum(weighted, axis=1)                      # (BB, H)
    sumsq = jnp.sum(weighted * weighted, axis=1)           # (BB, H)

    avg = sum_w
    mu = sum_w / seq_len
    var = (sumsq - seq_len * mu * mu) / (seq_len - 1)      # unbiased, like torch.std(dim=1)
    var = jnp.maximum(var, 0.0) + _NOISE_STD * _NOISE_STD  # cancellation guard + noise floor
    std = jnp.sqrt(var)                                    # (BB, H)

    # two lane-aligned stores instead of a concatenate
    o_ref[:, :hidden] = avg.astype(o_ref.dtype)
    o_ref[:, hidden:] = std.astype(o_ref.dtype)


def _self_attention_mean_kernel(x_ref, w_ref, o_ref):
    """mean_only=True path: out = sum_T(weighted).  Shapes as above, o_ref (BB, H)."""
    x = x_ref[...].astype(jnp.float32)                     # (BB, T, H)
    w = w_ref[...].astype(jnp.float32)                     # (1, H)
    s = jnp.sum(x * w[None], axis=-1, keepdims=True)       # (BB, T, 1)
    t = jnp.tanh(s)
    m = jnp.max(t, axis=1, keepdims=True)
    p = jnp.exp(t - m)
    denom = jnp.sum(p, axis=1, keepdims=True)
    a = p * pl.reciprocal(denom, approx=True)
    o_ref[...] = jnp.sum(x * a, axis=1).astype(o_ref.dtype)


# ----------------------------------------------------------------------------
# Block-size selection
# ----------------------------------------------------------------------------
def _pick_block_batch(B, T, H, itemsize):
    """Pick BB (rows per grid step).

    Priorities: fit the double-buffered input stream in a conservative VMEM
    budget (safe on v7x's 64 MiB / v5e's 16 MiB scoped default), keep the grid
    length >= 2 (two TensorCores on v7x), prefer BB multiple of 8 (sublane-
    dense output store), then maximize BB (fewer grid steps, bigger DMAs).
    """
    budget = 8 * 1024 * 1024            # per-stream, double-buffered
    per_row = 2 * T * H * itemsize      # x tile, x2 pipeline buffers
    divisors = [d for d in range(1, B + 1) if B % d == 0]
    return max(
        divisors,
        key=lambda d: (d * per_row <= budget, (B // d) >= 2, d % 8 == 0, d),
    )


# ----------------------------------------------------------------------------
# Wrapper
# ----------------------------------------------------------------------------
def self_attention_forward(inputs, att_weights, *, mean_only=False):
    """inputs: (B, T, H), att_weights: (1, H).

    Matches SelfAttention.forward: softmax_T(tanh(inputs @ w^T)) attention,
    then [sum_T(weighted), std_T(weighted + 1e-5*noise)] (or just sum_T if
    mean_only).  The B==1 and B>1 branches of the PyTorch code compute the
    same math (softmax over the sequence axis), so one kernel covers both.
    """
    B, T, H = inputs.shape
    att_weights = att_weights.reshape(1, H)
    bb = _pick_block_batch(B, T, H, jnp.dtype(inputs.dtype).itemsize)
    grid = (B // bb,)

    if mean_only:
        out_cols = H
        kernel = _self_attention_mean_kernel
    else:
        out_cols = 2 * H
        kernel = functools.partial(
            _self_attention_full_kernel, seq_len=float(T), hidden=H)

    return pl.pallas_call(
        kernel,
        out_shape=jax.ShapeDtypeStruct((B, out_cols), inputs.dtype),
        grid=grid,
        in_specs=[
            pl.BlockSpec((bb, T, H), lambda b: (b, 0, 0)),
            pl.BlockSpec((1, H), lambda b: (0, 0)),
        ],
        out_specs=pl.BlockSpec((bb, out_cols), lambda b: (b, 0)),
        compiler_params=pltpu.CompilerParams(
            dimension_semantics=("parallel",)),
    )(inputs, att_weights)


# ----------------------------------------------------------------------------
# Pure-JAX reference (sanity check)
# ----------------------------------------------------------------------------
def reference_forward(inputs, att_weights, mean_only=False):
    x = inputs.astype(jnp.float32)
    w = att_weights.astype(jnp.float32).reshape(-1)
    scores = jnp.einsum("bth,h->bt", x, w)                              # (B, T)
    att = jax.nn.softmax(jnp.tanh(scores), axis=1)[..., None]           # (B, T, 1)
    weighted = x * att                                                  # (B, T, H)
    avg = weighted.sum(axis=1)                                          # (B, H)
    if mean_only:
        return avg
    std = jnp.sqrt(jnp.var(weighted, axis=1, ddof=1) + _NOISE_STD ** 2)
    return jnp.concatenate([avg, std], axis=1)                          # (B, 2H)


# ----------------------------------------------------------------------------
# Main
# ----------------------------------------------------------------------------
if __name__ == "__main__":
    B, T, H = 16, 32, 128   # small; H and 2H lane-dense, BB=8 sublane-dense, grid=2

    key = jax.random.PRNGKey(0)
    kx, kw = jax.random.split(key)
    inputs = jax.random.normal(kx, (B, T, H), dtype=jnp.float32)
    bound = (6.0 / H) ** 0.5  # kaiming_uniform_-style range
    att_weights = jax.random.uniform(kw, (1, H), jnp.float32, -bound, bound)

    # full path
    fwd = jax.jit(functools.partial(self_attention_forward, mean_only=False))
    out = jax.block_until_ready(fwd(inputs, att_weights))
    ref = reference_forward(inputs, att_weights)
    assert out.shape == (B, 2 * H), out.shape
    assert jnp.allclose(out, ref, atol=2e-3, rtol=2e-3), \
        float(jnp.max(jnp.abs(out - ref)))

    # mean_only path
    fwd_m = jax.jit(functools.partial(self_attention_forward, mean_only=True))
    out_m = jax.block_until_ready(fwd_m(inputs, att_weights))
    ref_m = reference_forward(inputs, att_weights, mean_only=True)
    assert out_m.shape == (B, H), out_m.shape
    assert jnp.allclose(out_m, ref_m, atol=2e-3, rtol=2e-3), \
        float(jnp.max(jnp.abs(out_m - ref_m)))

    print("KERNEL_OK")
</pallas_src>

<mosaic_0001>
module attributes {stable_mosaic.version = 11 : i64} {
  func.func @_self_attention_full_kernel(%arg0: i32, %arg1: memref<8x32x128xf32, #tpu.memory_space<vmem>>, %arg2: memref<1x128xf32, #tpu.memory_space<vmem>>, %arg3: memref<8x256xf32, #tpu.memory_space<vmem>>) attributes {dimension_semantics = [#tpu.dimension_semantics<parallel>], iteration_bounds = array<i64: 2>, scalar_prefetch = 0 : i64, scratch_operands = 0 : i64, tpu.core_type = #tpu.core_type<tc>, window_params = [{transform_indices = @transform_0, window_bounds = array<i64: 8, 32, 128>}, {pipeline_mode = #tpu.pipeline_mode<synchronous>, transform_indices = @transform_1, window_bounds = array<i64: 1, 128>}, {transform_indices = @transform_2, window_bounds = array<i64: 8, 256>}]} {
    %c0 = arith.constant 0 : index
    %c0_0 = arith.constant 0 : index
    %c0_1 = arith.constant 0 : index
    %0 = vector.load %arg1[%c0, %c0_0, %c0_1] : memref<8x32x128xf32, #tpu.memory_space<vmem>>, vector<8x32x128xf32>
    %c0_2 = arith.constant 0 : index
    %c0_3 = arith.constant 0 : index
    %1 = vector.load %arg2[%c0_2, %c0_3] : memref<1x128xf32, #tpu.memory_space<vmem>>, vector<1x128xf32>
    %2 = vector.shape_cast %1 : vector<1x128xf32> to vector<1x1x128xf32>
    %3 = vector.broadcast %2 : vector<1x1x128xf32> to vector<8x32x128xf32>
    %4 = arith.mulf %0, %3 : vector<8x32x128xf32>
    %cst = arith.constant dense<0.000000e+00> : vector<8x32xf32>
    %5 = vector.multi_reduction <add>, %4, %cst [2] : vector<8x32x128xf32> to vector<8x32xf32>
    %6 = vector.shape_cast %5 : vector<8x32xf32> to vector<8x32x1xf32>
    %7 = math.tanh %6 : vector<8x32x1xf32>
    %cst_4 = arith.constant dense<0xFF800000> : vector<8x1xf32>
    %8 = vector.multi_reduction <maximumf>, %7, %cst_4 [1] : vector<8x32x1xf32> to vector<8x1xf32>
    %9 = vector.shape_cast %8 : vector<8x1xf32> to vector<8x1x1xf32>
    %10 = vector.broadcast %9 : vector<8x1x1xf32> to vector<8x32x1xf32>
    %11 = arith.subf %7, %10 : vector<8x32x1xf32>
    %12 = math.exp %11 : vector<8x32x1xf32>
    %cst_5 = arith.constant dense<0.000000e+00> : vector<8x1xf32>
    %13 = vector.multi_reduction <add>, %12, %cst_5 [1] : vector<8x32x1xf32> to vector<8x1xf32>
    %14 = vector.shape_cast %13 : vector<8x1xf32> to vector<8x1x1xf32>
    %15 = tpu.reciprocal %14 {approx = true} : vector<8x1x1xf32> -> vector<8x1x1xf32>
    %16 = vector.broadcast %15 : vector<8x1x1xf32> to vector<8x32x1xf32>
    %17 = arith.mulf %12, %16 : vector<8x32x1xf32>
    %18 = vector.broadcast %17 : vector<8x32x1xf32> to vector<8x32x128xf32>
    %19 = arith.mulf %0, %18 : vector<8x32x128xf32>
    %cst_6 = arith.constant dense<0.000000e+00> : vector<8x128xf32>
    %20 = vector.multi_reduction <add>, %19, %cst_6 [1] : vector<8x32x128xf32> to vector<8x128xf32>
    %21 = arith.mulf %19, %19 : vector<8x32x128xf32>
    %cst_7 = arith.constant dense<0.000000e+00> : vector<8x128xf32>
    %22 = vector.multi_reduction <add>, %21, %cst_7 [1] : vector<8x32x128xf32> to vector<8x128xf32>
    %cst_8 = arith.constant 3.200000e+01 : f32
    %23 = vector.broadcast %cst_8 : f32 to vector<8x128xf32>
    %24 = arith.divf %20, %23 : vector<8x128xf32>
    %cst_9 = arith.constant 3.200000e+01 : f32
    %25 = vector.broadcast %cst_9 : f32 to vector<8x128xf32>
    %26 = arith.mulf %25, %24 : vector<8x128xf32>
    %27 = arith.mulf %26, %24 : vector<8x128xf32>
    %28 = arith.subf %22, %27 : vector<8x128xf32>
    %cst_10 = arith.constant 3.100000e+01 : f32
    %29 = vector.broadcast %cst_10 : f32 to vector<8x128xf32>
    %30 = arith.divf %28, %29 : vector<8x128xf32>
    %cst_11 = arith.constant 0.000000e+00 : f32
    %31 = vector.broadcast %cst_11 : f32 to vector<8x128xf32>
    %32 = arith.maximumf %30, %31 : vector<8x128xf32>
    %cst_12 = arith.constant 1.000000e-10 : f32
    %33 = vector.broadcast %cst_12 : f32 to vector<8x128xf32>
    %34 = arith.addf %32, %33 : vector<8x128xf32>
    %35 = math.sqrt %34 : vector<8x128xf32>
    %c0_13 = arith.constant 0 : index
    %c0_14 = arith.constant 0 : index
    %36 = vector.load %arg3[%c0_13, %c0_14] : memref<8x256xf32, #tpu.memory_space<vmem>>, vector<8x128xf32>
    tpu.vector_store %arg3[%c0_13, %c0_14], %20 {strides = array<i32>} : memref<8x256xf32, #tpu.memory_space<vmem>>, vector<8x128xf32>,
    %c0_15 = arith.constant 0 : index
    %c128 = arith.constant 128 : index
    %37 = vector.load %arg3[%c0_15, %c128] : memref<8x256xf32, #tpu.memory_space<vmem>>, vector<8x128xf32>
    tpu.vector_store %arg3[%c0_15, %c128], %35 {strides = array<i32>} : memref<8x256xf32, #tpu.memory_space<vmem>>, vector<8x128xf32>,
    return
  }
  func.func @transform_0(%arg0: i32) -> (i32, i32, i32) {
    %c0_i32 = arith.constant 0 : i32
    %c0_i32_0 = arith.constant 0 : i32
    %c0_i32_1 = arith.constant 0 : i32
    return %arg0, %c0_i32, %c0_i32_0 : i32, i32, i32
  }
  func.func @transform_1(%arg0: i32) -> (i32, i32) {
    %c0_i32 = arith.constant 0 : i32
    %c0_i32_0 = arith.constant 0 : i32
    %c0_i32_1 = arith.constant 0 : i32
    return %c0_i32, %c0_i32_0 : i32, i32
  }
  func.func @transform_2(%arg0: i32) -> (i32, i32) {
    %c0_i32 = arith.constant 0 : i32
    %c0_i32_0 = arith.constant 0 : i32
    return %arg0, %c0_i32 : i32, i32
  }
}

</mosaic_0001>

<bundles_post_ra>
// kernel: self_attention_forward.1
= control target key start
LH: loop header
LB: loop body
LE: loop exit
PB: predicated region body
PF: predicated region fallthrough
CT: control target
= control target key end

     0   :  { %7 = vsyncpa [#allocation3], 0  ;;  %s2146_s0 = inlined_call_operand.hbm [shape: f32[16,32,128], index: 0, kind: input, shape index: {}]   ;;  %s2147_s1 = inlined_call_operand.vmem [shape: f32[1,128], index: 1, kind: input, shape index: {}]   ;;  %s2148_s2 = inlined_call_operand.hbm [shape: f32[16,256], index: 2, kind: output, shape index: {}]  }
   0x1   :  { %9 = vsyncpa [#allocation3 + $0x1], 0 }
   0x2   :  { %10 = vsyncpa [#allocation4], 0 }
   0x3   :  { %12 = vsyncpa [#allocation4 + $0x1], 0  ;;  %s1413_s9 = smov 0   ;;  %s1415_s10 = smov 0  }
   0x4   :  { %s1417_s11 = smov 0   ;;  %s1419_s12 = smov 0  }
   0x5 LB: > { %s1434_s13 = sadd.s32 4294967295, %s1392_s12   ;;  %s1059_s14 = sadd.s32 4294967294, %s1392_s12   ;;  %s1392_s12 = sphi %s1419_s12, %s2175_s12   ;;  %s1388_s11 = sphi %s1417_s11, %s2174_s11   ;;  %s1384_s10 = sphi %s1415_s10, %s2173_s10   ;;  %s1380_s9 = sphi %s1413_s9, %s2172_s9  }
   0x6   : > { %s1438_s15 = sadd.s32 1, %s1392_s12   ;;  %s25_s16 = sadd.s32 1, %s1388_s11 }
   0x7   : > { %s22_s17 = ssub.s32 %s1392_s12, %s1438_s15  ;;  %p32_p0 = scmp.ne.s32.totalorder %s1388_s11, %s1384_s10 }
   0x8   : > { %p23_p1 = scmp.eq.s32.totalorder %s22_s17, 0  ;;  %p33_p2 = scmp.eq.s32.totalorder %s1392_s12, 0 }
   0x9   : > { %p38_p3 = scmp.ne.s32.totalorder %s1384_s10, %s1380_s9  ;;  %p39_p4 = scmp.eq.s32.totalorder %s1434_s13, 0 }
   0xa   : > { %s1450_s18 = scalar_select %p23_p1, %s1388_s11, %s25_s16  }
   0xb   : > { %p1452_p5 = por %p33_p2, %p32_p0  ;;  %p1456_p6 = por %p39_p4, %p38_p3 }
   0xc   : > { %p83_p7 = scmp.eq.s32.totalorder %s1434_s13, 1  ;;  %p89_p8 = scmp.eq.s32.totalorder %s1059_s14, 1 }
   0xd   : > { %s2156_s20 = scalar_select %p1456_p6, 1, 0 }
   0xe   : > { %p1090_p10 = scmp.lt.s32.totalorder %s1392_s12, 2  ;;  %p1463_p11 = por %p83_p7, %p32_p0 }
   0xf   : > { %p1467_p12 = por %p89_p8, %p38_p3  ;;  %s112_s23 = sand.u32 1, %s1388_s11  }
  0x10   : > { %s2157_s21 = scalar_select %p1463_p11, 1, 0 }
  0x11   : > { %s2158_s22 = scalar_select %p1467_p12, 1, 0 }
  0x12   : > { %s1076_s24 = sshll.u32 %s1392_s12, 12  ;;  %s1062_s25 = sshll.u32 %s112_s23, 8 }
  0x13   : > { %s1476_s28 = scalar_lea.hbm %s2146_s0, %s1076_s24  ;;  %s116_s29 = scalar_lea.vmem [#allocation2], %s1062_s25 }
  0x14   : > { %s124_s30 = sshll.u32 %s116_s29, 4  ;;  %p1480_p13 = pnand %p1090_p10, %p1452_p5  ;;  %s1484_s30 = int_to_ptr.vmem [resolvable:$true] %s124_s30 }
  0x15   : > { %s1486_s4 = scalar_lea.sflag [#allocation3], %s112_s23  ;;  %s1300_s5 = scalar_lea.hbm %s1476_s28, 4096 }
  0x16   : > { %p1301_p0 = scmp.ne.s32.totalorder %s1476_s28, %s1300_s5  ;;  %p1302_p1 = pneg %p1480_p13 }
  0x17   : > { %s1305_s8 = scalar_lea.hbm %s2146_s0, 8192  ;;  %p1306_p4 = scmp.lt.s32.totalorder %s1476_s28, %s2146_s0 }
  0x18   : > { %p1303_p2 = pnand %p1302_p1, %p1301_p0  ;;  %p1307_p5 = scmp.lt.s32.totalorder %s1305_s8, %s1300_s5 }
  0x1a   : > { %p1304_p3 = pneg %p1303_p2  ;;  %p1308_p7 = por %p1307_p5, %p1306_p4 }
  0x1c   : > { %p1309_p8 = pnand %p1308_p7, %p1304_p3 }
  0x1e   : > { %1312 = shalt.err (!%p1309_p8)
}
  0x1f   : > { %s1313_s17 = scalar_lea.vmem %s1484_s30, 4096  ;;  %s1394_s19 = smov [#allocation2]  }
  0x20   : > { %p1314_p10 = scmp.ne.s32.totalorder %s1484_s30, %s1313_s17  ;;  %s1318_s23 = sshll.u32 %s1394_s19, 4  ;;  %s1319_s23 = int_to_ptr.vmem [resolvable:$false] %s1318_s23 }
  0x21   : > { %s1320_s24 = scalar_lea.vmem %s1319_s23, 8192  ;;  %p1321_p2 = scmp.lt.s32.totalorder %s1484_s30, %s1319_s23 }
  0x22   : > { %p1316_p9 = pnand %p1314_p10, %p1302_p1  ;;  %p1322_p12 = scmp.lt.s32.totalorder %s1320_s24, %s1313_s17 }
  0x24   : > { %p1317_p0 = pneg %p1316_p9  ;;  %p1323_p11 = por %p1322_p12, %p1321_p2 }
  0x26   : > { %p1324_p6 = pnand %p1323_p11, %p1317_p0 }
  0x28   : > { %1327 = shalt.err (!%p1324_p6)
}
  0x29   : > { %s1395_s25 = smov 128   ;;  %s1396_s26 = smov 8  }
  0x2a   : > { %1085 = dma.hbm_to_vmem [thread:$0]  (!%p1480_p13), %s1476_s28, 4096, %s1484_s30, %s1486_s4, %s1395_s25, %s1395_s25, %s1396_s26  }
  0x2b   : > { %p1066_p9 = scmp.ge.s32.totalorder %s1392_s12, 1  ;;  %p132_p1 = scmp.lt.s32.totalorder %s1392_s12, 3 }
  0x2d   : > { %p133_p3 = pnand %p1066_p9, %p132_p1 }
  0x2f   : > { %136 = sbr.rel (%p133_p3) target bundleno = 438 (0x1b6), region = 28 }
  0x34   : > { %s1510_s27 = sand.u32 1, %s1384_s10   ;;  %p2160_p6 = scmp.ne.s32.totalorder %s2156_s20, 0 }
  0x35   : > { %s1067_s29 = sshll.u32 %s1510_s27, 8  ;;  %s139_s5 = scalar_lea.sflag [#allocation3], %s1510_s27 }
  0x36   : > { %s1514_s6 = scalar_lea.vmem [#allocation2], %s1067_s29 }
  0x37   : > { %1371 = dma.done.wait (%p2160_p6), %s139_s5, 4096  }
  0x38   : > { %1373 = vsyncadd (%p2160_p6), %s139_s5, 4294963200  ;;  %v1521_v0 = vld [vmem:[%s1514_s6 + $0x20] sm:$0xff]  ;;  %v1536_v5 = vld [vmem:[%s1514_s6 + $0x28] sm:$0xff]  ;;  %vm941_vm0 = vcmask 1041409   ;;  %vm943_vm1 = vcmask 1042434   ;;  %vm945_vm2 = vcmask 1043459  }
  0x39   : > { %v1526_v1 = vld [vmem:[%s2147_s1] ss:$0 sm:$0xff]  ;;  %v1539_v6 = vld [vmem:[%s1514_s6 + $0x8] sm:$0xff]  ;;  %v1556_v13 = vld [vmem:[%s1514_s6 + $0x30] sm:$0xff]  ;;  %vm947_vm3 = vcmask 1044484   ;;  %s1068_s20 = sshll.u32 %s1510_s27, 4 }
  0x3a   : > { %v1529_v2 = vld [vmem:[%s1514_s6] sm:$0xff]  ;;  %v207_v3 = vmul.f32 %v1526_v1, %v1521_v0  ;;  %v208_v7 = vmul.f32 %v1526_v1, %v1536_v5  ;;  %v204_v8 = vmul.f32 %v1526_v1, %v1539_v6  ;;  %v1546_v9 = vld [vmem:[%s1514_s6 + $0x48] sm:$0xff]  ;;  %v1559_v14 = vld [vmem:[%s1514_s6 + $0x10] sm:$0xff]  ;;  %v209_v15 = vmul.f32 %v1526_v1, %v1556_v13  ;;  %s2046_s3 = scalar_lea.vmem [#allocation5], %s1068_s20  ;;  %s1077_s4 = sshll.u32 %s1434_s13, 8 }
  0x3b   : > { %v203_v4 = vmul.f32 %v1526_v1, %v1529_v2  ;;  %v1549_v10 = vld [vmem:[%s1514_s6 + $0x40] sm:$0xff]  ;;  %v212_v11 = vmul.f32 %v1526_v1, %v1546_v9  ;;  %v205_v16 = vmul.f32 %v1526_v1, %v1559_v14  ;;  %v1566_v17 = vld [vmem:[%s1514_s6 + $0x68] sm:$0xff]  ;;  %v1577_v22 = vld [vmem:[%s1514_s6 + $0x50] sm:$0xff]  ;;  %vm949_vm4 = vcmask 1045509   ;;  %s989_s7 = sshll.u32 %s2046_s3, 4  ;;  %s2107_s16 = scalar_lea.hbm %s2148_s2, %s1077_s4  ;;  %s990_s7 = int_to_ptr.vmem [resolvable:$true] %s989_s7 }
  0x3c   : > { %243 = vadd.xlane.f32.xlu1 %v207_v3  ;;  %v211_v12 = vmul.f32 %v1526_v1, %v1549_v10  ;;  %2161 = vst [vmem:[#allocation8_spill] sm:$0xff] %v1566_v17  ;;  %v1569_v18 = vld [vmem:[%s1514_s6 + $0x60] sm:$0xff]  ;;  %v216_v19 = vmul.f32 %v1526_v1, %v1566_v17  ;;  %v213_v24 = vmul.f32 %v1526_v1, %v1577_v22  ;;  %v1583_v25 = vld [vmem:[%s1514_s6 + $0x18] sm:$0xff]  ;;  %v181_v26 = vld [vmem:[%s1514_s6 + $0x88] sm:$0xff]  ;;  %vm951_vm5 = vcmask 1046534   ;;  %s975_s13 = scalar_lea.sflag [#allocation4], %s1510_s27 }
  0x3d   : > { %235 = vadd.xlane.f32.xlu0 %v203_v4  ;;  %v215_v20 = vmul.f32 %v1526_v1, %v1569_v18  ;;  %v180_v21 = vld [vmem:[%s1514_s6 + $0x80] sm:$0xff]  ;;  %v206_v27 = vmul.f32 %v1526_v1, %v1583_v25  ;;  %v220_v28 = vmul.f32 %v1526_v1, %v181_v26  ;;  %v1590_v29 = vld [vmem:[%s1514_s6 + $0x70] sm:$0xff]  ;;  %v1593_v30 = vld [vmem:[%s1514_s6 + $0x38] sm:$0xff]  ;;  %vm953_vm6 = vcmask 1047559   ;;  %s1328_s17 = scalar_lea.vmem %s990_s7, 256  ;;  %p2169_p12 = scmp.ne.s32.totalorder %s2157_s21, 0 }
  0x3e   : > { %v219_v23 = vmul.f32 %v1526_v1, %v180_v21  ;;  %2162 = vst [vmem:[#allocation9_spill] sm:$0xff] %v1590_v29  ;;  %v217_v31 = vmul.f32 %v1526_v1, %v1590_v29  ;;  %v210_v32 = vmul.f32 %v1526_v1, %v1593_v30  ;;  %v185_v33 = vld [vmem:[%s1514_s6 + $0xa8] sm:$0xff]  ;;  %v184_v34 = vld [vmem:[%s1514_s6 + $0xa0] sm:$0xff]  ;;  %v1604_v37 = vld [vmem:[%s1514_s6 + $0x90] sm:$0xff]  ;;  %p1329_p11 = scmp.ne.s32.totalorder %s990_s7, %s1328_s17  ;;  %s1397_s19 = smov [#allocation5]  }
  0x3f   : > { %v224_v35 = vmul.f32 %v1526_v1, %v185_v33  ;;  %v223_v36 = vmul.f32 %v1526_v1, %v184_v34  ;;  %2163 = vst [vmem:[#allocation10_spill] sm:$0xff] %v1604_v37  ;;  %v1607_v38 = vld [vmem:[%s1514_s6 + $0x58] sm:$0xff]  ;;  %v221_v39 = vmul.f32 %v1526_v1, %v1604_v37  ;;  %v189_v41 = vld [vmem:[%s1514_s6 + $0xc8] sm:$0xff]  ;;  %v188_v42 = vld [vmem:[%s1514_s6 + $0xc0] sm:$0xff]  ;;  %s1332_s23 = sshll.u32 %s1397_s19, 4  ;;  %s1333_s23 = int_to_ptr.vmem [resolvable:$false] %s1332_s23 }
  0x40   : > { %245 = vadd.xlane.f32.xlu1 %v208_v7  ;;  %v214_v40 = vmul.f32 %v1526_v1, %v1607_v38  ;;  %v228_v43 = vmul.f32 %v1526_v1, %v189_v41  ;;  %v227_v44 = vmul.f32 %v1526_v1, %v188_v42  ;;  %v186_v45 = vld [vmem:[%s1514_s6 + $0xb0] sm:$0xff]  ;;  %v1619_v46 = vld [vmem:[%s1514_s6 + $0x78] sm:$0xff]  ;;  %v193_v49 = vld [vmem:[%s1514_s6 + $0xe8] sm:$0xff]  ;;  %p1330_p13 = pnand %p1329_p11, %p2169_p12  ;;  %s1334_s24 = scalar_lea.vmem %s1333_s23, 512 }
  0x41   : > { %237 = vadd.xlane.f32.xlu0 %v204_v8  ;;  %v225_v47 = vmul.f32 %v1526_v1, %v186_v45  ;;  %v218_v48 = vmul.f32 %v1526_v1, %v1619_v46  ;;  %v192_v50 = vld [vmem:[%s1514_s6 + $0xe0] sm:$0xff]  ;;  %v232_v51 = vmul.f32 %v1526_v1, %v193_v49  ;;  %v190_v53 = vld [vmem:[%s1514_s6 + $0xd0] sm:$0xff]  ;;  %v1630_v54 = vld [vmem:[%s1514_s6 + $0x98] sm:$0xff]  ;;  %p1335_p5 = scmp.lt.s32.totalorder %s990_s7, %s1333_s23  ;;  %p1336_p7 = scmp.lt.s32.totalorder %s1334_s24, %s1328_s17 }
  0x42   : > { %v231_v52 = vmul.f32 %v1526_v1, %v192_v50  ;;  %2164 = vst [vmem:[#allocation11_spill] sm:$0xff] %v1630_v54  ;;  %v229_v55 = vmul.f32 %v1526_v1, %v190_v53  ;;  %v222_v56 = vmul.f32 %v1526_v1, %v1630_v54  ;;  %v194_v57 = vld [vmem:[%s1514_s6 + $0xf0] sm:$0xff]  ;;  %v187_v58 = vld [vmem:[%s1514_s6 + $0xb8] sm:$0xff]  ;;  %p1331_p4 = pneg %p1330_p13 }
  0x43   : > { %v233_v59 = vmul.f32 %v1526_v1, %v194_v57  ;;  %v226_v60 = vmul.f32 %v1526_v1, %v187_v58  ;;  %v195_v61 = vld [vmem:[%s1514_s6 + $0xf8] sm:$0xff]  ;;  %p1337_p8 = por %p1336_p7, %p1335_p5 }
  0x44   : > { %253 = vadd.xlane.f32.xlu1 %v212_v11  ;;  %v191_v62 = vld [vmem:[%s1514_s6 + $0xd8] sm:$0xff]  ;;  %v234_v63 = vmul.f32 %v1526_v1, %v195_v61 }
  0x45   : > { %251 = vadd.xlane.f32.xlu0 %v211_v12  ;;  %v230_v3 = vmul.f32 %v1526_v1, %v191_v62  ;;  %p1338_p10 = pnand %p1337_p8, %p1331_p4 }
  0x48   : > { %247 = vadd.xlane.f32.xlu1 %v209_v15 }
  0x49   : > { %239 = vadd.xlane.f32.xlu0 %v205_v16 }
  0x4c   : > { %261 = vadd.xlane.f32.xlu1 %v216_v19 }
  0x4d   : > { %259 = vadd.xlane.f32.xlu0 %v215_v20 }
  0x50   : > { %267 = vadd.xlane.f32.xlu1 %v219_v23 }
  0x51   : > { %255 = vadd.xlane.f32.xlu0 %v213_v24 }
  0x54   : > { %241 = vadd.xlane.f32.xlu1 %v206_v27 }
  0x55   : > { %269 = vadd.xlane.f32.xlu0 %v220_v28 }
  0x58   : > { %263 = vadd.xlane.f32.xlu1 %v217_v31 }
  0x59   : > { %249 = vadd.xlane.f32.xlu0 %v210_v32 }
  0x5c   : > { %277 = vadd.xlane.f32.xlu1 %v224_v35 }
  0x5d   : > { %275 = vadd.xlane.f32.xlu0 %v223_v36 }
  0x60   : > { %271 = vadd.xlane.f32.xlu1 %v221_v39 }
  0x61   : > { %257 = vadd.xlane.f32.xlu0 %v214_v40 }
  0x64   : > { %285 = vadd.xlane.f32.xlu1 %v228_v43 }
  0x65   : > { %283 = vadd.xlane.f32.xlu0 %v227_v44 }
  0x68   : > { %279 = vadd.xlane.f32.xlu1 %v225_v47 }
  0x69   : > { %265 = vadd.xlane.f32.xlu0 %v218_v48 }
  0x6c   : > { %293 = vadd.xlane.f32.xlu1 %v232_v51 }
  0x6d   : > { %291 = vadd.xlane.f32.xlu0 %v231_v52 }
  0x70   : > { %287 = vadd.xlane.f32.xlu1 %v229_v55 }
  0x71   : > { %273 = vadd.xlane.f32.xlu0 %v222_v56 }
  0x74   : > { %295 = vadd.xlane.f32.xlu1 %v233_v59 }
  0x75   : > { %281 = vadd.xlane.f32.xlu0 %v226_v60 }
  0x78   : > { %297 = vadd.xlane.f32.xlu1 %v234_v63 }
  0x79   : > { %289 = vadd.xlane.f32.xlu0 %v230_v3 }
  0xc5   : > { %v244_v4 = vpop.xlane.xlu1 %243 }
  0xc6   : > { %v236_v7 = vpop.xlane.xlu0 %235 }
  0xc9   : > { %v246_v8 = vpop.xlane.xlu1 %245 }
  0xca   : > { %v238_v11 = vpop.xlane.xlu0 %237 }
  0xcb   : > { %1126 = vtanh.f32 %v238_v11 }
  0xcc   : > { %1128 = vtanh.f32 %v236_v7 }
  0xcd   : > { %v254_v12 = vpop.xlane.xlu1 %253 }
  0xce   : > { %v252_v15 = vpop.xlane.xlu0 %251 }
  0xd1   : > { %v248_v16 = vpop.xlane.xlu1 %247 }
  0xd2   : > { %v240_v19 = vpop.xlane.xlu0 %239 }
  0xd3   : > { %1130 = vtanh.f32 %v240_v19 }
  0xd4   : > { %1132 = vtanh.f32 %v244_v4 }
  0xd5   : > { %v262_v20 = vpop.xlane.xlu1 %261  ;;  %1134 = vtanh.f32 %v246_v8 }
  0xd6   : > { %v260_v21 = vpop.xlane.xlu0 %259 }
  0xd8   : > { %v1643_v31 = vpop.eup %1126 }
  0xd9   : > { %v268_v23 = vpop.xlane.xlu1 %267  ;;  %v1645_v34 = vpop.eup %1128 }
  0xda   : > { %v256_v24 = vpop.xlane.xlu0 %255  ;;  %v331_v36 = vmax.f32 %v1645_v34, %v1643_v31 }
  0xdd   : > { %v242_v1 = vpop.xlane.xlu1 %241 }
  0xde   : > { %v270_v26 = vpop.xlane.xlu0 %269  ;;  %1136 = vtanh.f32 %v242_v1 }
  0xdf   : > { %1138 = vtanh.f32 %v248_v16 }
  0xe0   : > { %v1647_v35 = vpop.eup %1130 }
  0xe1   : > { %v264_v27 = vpop.xlane.xlu1 %263  ;;  %v1651_v39 = vpop.eup %1132  ;;  %v332_v43 = vmax.f32 %v331_v36, %v1647_v35 }
  0xe2   : > { %v250_v28 = vpop.xlane.xlu0 %249  ;;  %v1653_v42 = vpop.eup %1134 }
  0xe3   : > { %1140 = vtanh.f32 %v250_v28  ;;  %v340_v48 = vmax.f32 %v1651_v39, %v1653_v42 }
  0xe4   : > { %1142 = vtanh.f32 %v254_v12 }
  0xe5   : > { %1144 = vtanh.f32 %v252_v15  ;;  %v278_v32 = vpop.xlane.xlu1 %277 }
  0xe6   : > { %v276_v33 = vpop.xlane.xlu0 %275  ;;  %1146 = vtanh.f32 %v256_v24 }
  0xe9   : > { %v272_v40 = vpop.xlane.xlu1 %271 }
  0xea   : > { %v258_v41 = vpop.xlane.xlu0 %257 }
  0xeb   : > { %v1137_v44 = vpop.eup %1136  ;;  %1148 = vtanh.f32 %v258_v41 }
  0xec   : > { %v1656_v45 = vpop.eup %1138  ;;  %v333_v47 = vmax.f32 %v332_v43, %v1137_v44  ;;  %1150 = vtanh.f32 %v262_v20 }
  0xed   : > { %v286_v49 = vpop.xlane.xlu1 %285  ;;  %1152 = vtanh.f32 %v260_v21  ;;  %v341_v52 = vmax.f32 %v340_v48, %v1656_v45 }
  0xee   : > { %v284_v50 = vpop.xlane.xlu0 %283  ;;  %v334_v51 = vrot.slane %v333_v47, 4  ;;  %1154 = vtanh.f32 %v264_v27 }
  0xef   : > { %1156 = vtanh.f32 %v268_v23 }
  0xf0   : > { %v1661_v53 = vpop.eup %1140  ;;  %v335_v55 = vmax.f32 %v333_v47, %v334_v51  ;;  %1158 = vtanh.f32 %v270_v26 }
  0xf1   : > { %v1663_v56 = vpop.eup %1142  ;;  %v342_v57 = vmax.f32 %v341_v52, %v1661_v53  ;;  %v280_v58 = vpop.xlane.xlu1 %279 }
  0xf2   : > { %v266_v59 = vpop.xlane.xlu0 %265  ;;  %v1666_v60 = vpop.eup %1144  ;;  %v336_v61 = vrot.slane %v335_v55, 2 }
  0xf3   : > { %v343_v62 = vrot.slane %v342_v57, 4  ;;  %1160 = vtanh.f32 %v266_v59  ;;  %v1668_v63 = vpop.eup %1146  ;;  %v349_v4 = vmax.f32 %v1666_v60, %v1663_v56 }
  0xf4   : > { %v337_v3 = vmax.f32 %v335_v55, %v336_v61  ;;  %1162 = vtanh.f32 %v278_v32 }
  0xf5   : > { %v344_v7 = vmax.f32 %v342_v57, %v343_v62  ;;  %1164 = vtanh.f32 %v276_v33  ;;  %v294_v8 = vpop.xlane.xlu1 %293  ;;  %v350_v15 = vmax.f32 %v349_v4, %v1668_v63 }
  0xf6   : > { %v292_v11 = vpop.xlane.xlu0 %291  ;;  %v338_v12 = vrot.slane %v337_v3, 1  ;;  %1166 = vtanh.f32 %v272_v40 }
  0xf7   : > { %v345_v16 = vrot.slane %v344_v7, 2  ;;  %1168 = vtanh.f32 %v286_v49 }
  0xf8   : > { %v1673_v19 = vpop.eup %1148  ;;  %v339_v20 = vmax.f32 %v337_v3, %v338_v12  ;;  %1170 = vtanh.f32 %v284_v50 }
  0xf9   : > { %v346_v21 = vmax.f32 %v344_v7, %v345_v16  ;;  %v351_v23 = vmax.f32 %v350_v15, %v1673_v19  ;;  %1172 = vtanh.f32 %v280_v58  ;;  %v1676_v24 = vpop.xlane.xlu1 %287  ;;  %v1678_v26 = vpop.eup %1150 }
  0xfa   : > { %v274_v1 = vpop.xlane.xlu0 %273  ;;  %v403_v27 = vsub.f32 %v1645_v34, %v339_v20  ;;  %v404_v28 = vsub.f32 %v1643_v31, %v339_v20  ;;  %v405_v32 = vsub.f32 %v1647_v35, %v339_v20  ;;  %v406_v33 = vsub.f32 %v1137_v44, %v339_v20  ;;  %v1683_v36 = vpop.eup %1152 }
  0xfb   : > { %v347_v40 = vrot.slane %v346_v21, 1  ;;  %v352_v41 = vrot.slane %v351_v23, 4  ;;  %1174 = vtanh.f32 %v294_v8  ;;  %v1685_v49 = vpop.eup %1154  ;;  %v358_v31 = vmax.f32 %v1683_v36, %v1678_v26 }
  0xfc   : > { %v435_v43 = vmul.f32 1.442695, %v403_v27  ;;  %v437_v47 = vmul.f32 1.442695, %v404_v28  ;;  %v439_v48 = vmul.f32 1.442695, %v405_v32  ;;  %1176 = vtanh.f32 %v274_v1  ;;  %v1687_v34 = vpop.eup %1156 }
  0xfd   : > { %v441_v50 = vmul.f32 1.442695, %v406_v33  ;;  %v348_v51 = vmax.f32 %v346_v21, %v347_v40  ;;  %v353_v52 = vmax.f32 %v351_v23, %v352_v41  ;;  %1178 = vtanh.f32 %v292_v11  ;;  %v1691_v35 = vpop.eup %1158  ;;  %v296_v58 = vpop.xlane.xlu1 %295 }
  0xfe   : > { %1180 = vpow2.f32 %v435_v43  ;;  %v359_v61 = vmax.f32 %v358_v31, %v1685_v49  ;;  %v282_v15 = vpop.xlane.xlu0 %281  ;;  %v367_v1 = vmax.f32 %v1687_v34, %v1691_v35 }
  0xff   : > { %1182 = vpow2.f32 %v437_v47  ;;  %v407_v44 = vsub.f32 %v1651_v39, %v348_v51  ;;  %v408_v55 = vsub.f32 %v1653_v42, %v348_v51  ;;  %v409_v57 = vsub.f32 %v1656_v45, %v348_v51 }
 0x100   : > { %v1696_v59 = vpop.eup %1160  ;;  %1184 = vpow2.f32 %v439_v48  ;;  %v410_v62 = vsub.f32 %v1661_v53, %v348_v51  ;;  %v354_v3 = vrot.slane %v353_v52, 2 }
 0x101   : > { %v1700_v4 = vpop.eup %1162  ;;  %1186 = vpow2.f32 %v441_v50  ;;  %v443_v7 = vmul.f32 1.442695, %v407_v44  ;;  %v445_v8 = vmul.f32 1.442695, %v408_v55  ;;  %v447_v11 = vmul.f32 1.442695, %v409_v57  ;;  %v298_v33 = vpop.xlane.xlu1 %297 }
 0x102   : > { %v1702_v39 = vpop.eup %1164  ;;  %v449_v42 = vmul.f32 1.442695, %v410_v62  ;;  %v355_v12 = vmax.f32 %v353_v52, %v354_v3  ;;  %v360_v45 = vmax.f32 %v359_v61, %v1696_v59  ;;  %1188 = vtanh.f32 %v296_v58  ;;  %v290_v51 = vpop.xlane.xlu0 %289 }
 0x103   : > { %v1705_v16 = vpop.eup %1166  ;;  %1190 = vpow2.f32 %v443_v7 }
 0x104   : > { %v1707_v20 = vpop.eup %1168  ;;  %1192 = vpow2.f32 %v445_v8  ;;  %v356_v53 = vrot.slane %v355_v12, 1  ;;  %v361_v21 = vrot.slane %v360_v45, 4  ;;  %v368_v40 = vmax.f32 %v367_v1, %v1705_v16 }
 0x105   : > { %v1709_v23 = vpop.eup %1170  ;;  %1194 = vpow2.f32 %v447_v11 }
 0x106   : > { %v1713_v27 = vpop.eup %1172  ;;  %1196 = vpow2.f32 %v449_v42  ;;  %v357_v28 = vmax.f32 %v355_v12, %v356_v53  ;;  %v362_v32 = vmax.f32 %v360_v45, %v361_v21  ;;  %v376_v53 = vmax.f32 %v1702_v39, %v1700_v4 }
 0x107   : > { %1198 = vtanh.f32 %v282_v15 }
 0x108   : > { %v1716_v41 = vpop.eup %1174  ;;  %v411_v43 = vsub.f32 %v1666_v60, %v357_v28  ;;  %v412_v47 = vsub.f32 %v1663_v56, %v357_v28  ;;  %v413_v48 = vsub.f32 %v1668_v63, %v357_v28  ;;  %v414_v50 = vsub.f32 %v1673_v19, %v357_v28 }
 0x109   : > { %v1722_v52 = vpop.eup %1176  ;;  %v363_v31 = vrot.slane %v362_v32, 2  ;;  %1200 = vtanh.f32 %v298_v33 }
 0x10a   : > { %v1724_v44 = vpop.eup %1178  ;;  %v451_v55 = vmul.f32 1.442695, %v411_v43  ;;  %v453_v57 = vmul.f32 1.442695, %v412_v47  ;;  %1202 = vtanh.f32 %v1676_v24  ;;  %v369_v58 = vmax.f32 %v368_v40, %v1722_v52 }
 0x10b   : > { %v1728_v60 = vpop.eup %1180  ;;  %v455_v56 = vmul.f32 1.442695, %v413_v48  ;;  %v364_v61 = vmax.f32 %v362_v32, %v363_v31  ;;  %1204 = vtanh.f32 %v290_v51  ;;  %v457_v19 = vmul.f32 1.442695, %v414_v50 }
 0x10c   : > { %v1730_v63 = vpop.eup %1182  ;;  %1206 = vpow2.f32 %v451_v55  ;;  %v370_v62 = vrot.slane %v369_v58, 4  ;;  %v377_v48 = vmax.f32 %v376_v53, %v1713_v27 }
 0x10d   : > { %v1732_v3 = vpop.eup %1184  ;;  %v499_v7 = vadd.f32 %v1730_v63, %v1728_v60  ;;  %1208 = vpow2.f32 %v453_v57  ;;  %v365_v8 = vrot.slane %v364_v61, 1 }
 0x10e   : > { %v1736_v24 = vpop.eup %1186  ;;  %v371_v11 = vmax.f32 %v369_v58, %v370_v62  ;;  %1210 = vpow2.f32 %v455_v56 }
 0x10f   : > { %v1738_v42 = vpop.eup %1188  ;;  %v500_v12 = vadd.f32 %v1732_v3, %v499_v7  ;;  %v366_v45 = vmax.f32 %v364_v61, %v365_v8  ;;  %1212 = vpow2.f32 %v457_v19 }
 0x110   : > { %v1741_v15 = vpop.eup %1190  ;;  %v372_v21 = vrot.slane %v371_v11, 2 }
 0x111   : > { %v1745_v1 = vpop.eup %1192  ;;  %v501_v28 = vadd.f32 %v1736_v24, %v500_v12  ;;  %v415_v32 = vsub.f32 %v1683_v36, %v366_v45  ;;  %v416_v33 = vsub.f32 %v1678_v26, %v366_v45  ;;  %v417_v40 = vsub.f32 %v1685_v49, %v366_v45 }
 0x112   : > { %v1751_v43 = vpop.eup %1194  ;;  %v508_v47 = vadd.f32 %v1745_v1, %v1741_v15  ;;  %v418_v50 = vsub.f32 %v1696_v59, %v366_v45  ;;  %v373_v51 = vmax.f32 %v371_v11, %v372_v21  ;;  %v394_v26 = vmax.f32 %v1724_v44, %v1716_v41 }
 0x113   : > { %v1757_v31 = vpop.eup %1196  ;;  %v502_v55 = vrot.slane %v501_v28, 4  ;;  %v459_v57 = vmul.f32 1.442695, %v415_v32  ;;  %v461_v58 = vmul.f32 1.442695, %v416_v33  ;;  %v385_v12 = vmax.f32 %v1709_v23, %v1707_v20 }
 0x114   : > { %v1761_v36 = vpop.eup %1198  ;;  %v509_v49 = vadd.f32 %v1751_v43, %v508_v47  ;;  %v463_v56 = vmul.f32 1.442695, %v417_v40  ;;  %v465_v61 = vmul.f32 1.442695, %v418_v50  ;;  %v374_v19 = vrot.slane %v373_v51, 1 }
 0x115   : > { %v503_v62 = vadd.f32 %v502_v55, %v501_v28  ;;  %1214 = vpow2.f32 %v459_v57  ;;  %v395_v59 = vmax.f32 %v394_v26, %v1738_v42  ;;  %v378_v7 = vmax.f32 %v377_v48, %v1761_v36 }
 0x116   : > { %v1766_v8 = vpop.eup %1200  ;;  %v510_v11 = vadd.f32 %v1757_v31, %v509_v49  ;;  %1216 = vpow2.f32 %v461_v58  ;;  %v375_v45 = vmax.f32 %v373_v51, %v374_v19 }
 0x117   : > { %v1771_v53 = vpop.eup %1202  ;;  %v504_v21 = vrot.slane %v503_v62, 2  ;;  %1218 = vpow2.f32 %v463_v56  ;;  %v379_v32 = vrot.slane %v378_v7, 4  ;;  %v396_v28 = vmax.f32 %v395_v59, %v1766_v8 }
 0x118   : > { %v1774_v33 = vpop.eup %1204  ;;  %v511_v40 = vrot.slane %v510_v11, 4  ;;  %1220 = vpow2.f32 %v465_v61  ;;  %v419_v47 = vsub.f32 %v1687_v34, %v375_v45  ;;  %v420_v48 = vsub.f32 %v1691_v35, %v375_v45 }
 0x119   : > { %v1778_v50 = vpop.eup %1206  ;;  %v505_v55 = vadd.f32 %v504_v21, %v503_v62  ;;  %v421_v51 = vsub.f32 %v1705_v16, %v375_v45  ;;  %v422_v57 = vsub.f32 %v1722_v52, %v375_v45  ;;  %v380_v58 = vmax.f32 %v378_v7, %v379_v32 }
 0x11a   : > { %v1782_v26 = vpop.eup %1208  ;;  %v512_v49 = vadd.f32 %v511_v40, %v510_v11  ;;  %v467_v56 = vmul.f32 1.442695, %v419_v47  ;;  %v469_v19 = vmul.f32 1.442695, %v420_v48  ;;  %v397_v59 = vrot.slane %v396_v28, 4 }
 0x11b   : > { %v506_v54 = vrot.slane %v505_v55, 1  ;;  %v517_v34 = vadd.f32 %v1782_v26, %v1778_v50  ;;  %v386_v35 = vmax.f32 %v385_v12, %v1771_v53  ;;  %v471_v61 = vmul.f32 1.442695, %v421_v51  ;;  %v1787_v37 = vpop.eup %1210 }
 0x11c   : > { %v513_v62 = vrot.slane %v512_v49, 2  ;;  %1222 = vpow2.f32 %v467_v56  ;;  %v381_v16 = vrot.slane %v380_v58, 2  ;;  %v398_v52 = vmax.f32 %v396_v28, %v397_v59  ;;  %v1789_v7 = vpop.eup %1212 }
 0x11d   : > { %v507_v45 = vadd.f32 %v506_v54, %v505_v55  ;;  %v518_v11 = vadd.f32 %v1787_v37, %v517_v34  ;;  %1224 = vpow2.f32 %v469_v19  ;;  %v387_v21 = vmax.f32 %v386_v35, %v1774_v33 }
 0x11e   : > { %v514_v32 = vadd.f32 %v513_v62, %v512_v49  ;;  %v473_v40 = vmul.f32 1.442695, %v422_v57  ;;  %v382_v47 = vmax.f32 %v380_v58, %v381_v16  ;;  %v399_v48 = vrot.slane %v398_v52, 2 }
 0x11f   : > { %1226 = vrcp.f32 %v507_v45  ;;  %v519_v12 = vadd.f32 %v1789_v7, %v518_v11  ;;  %v388_v51 = vrot.slane %v387_v21, 4 }
 0x120   : > { %v515_v29 = vrot.slane %v514_v32, 1  ;;  %1228 = vpow2.f32 %v471_v61  ;;  %v383_v56 = vrot.slane %v382_v47, 1  ;;  %v400_v28 = vmax.f32 %v398_v52, %v399_v48 }
 0x121   : > { %v520_v59 = vrot.slane %v519_v12, 4  ;;  %v389_v17 = vmax.f32 %v387_v21, %v388_v51  ;;  %1230 = vpow2.f32 %v473_v40 }
 0x122   : > { %v1794_v54 = vpop.eup %1214  ;;  %v516_v55 = vadd.f32 %v515_v29, %v514_v32  ;;  %v384_v19 = vmax.f32 %v382_v47, %v383_v56  ;;  %v401_v34 = vrot.slane %v400_v28, 1 }
 0x123   : > { %v1796_v49 = vpop.eup %1216  ;;  %v521_v57 = vadd.f32 %v520_v59, %v519_v12  ;;  %v390_v58 = vrot.slane %v389_v17, 2 }
 0x124   : > { %v1798_v35 = vpop.eup %1218  ;;  %1232 = vrcp.f32 %v516_v55  ;;  %v526_v61 = vadd.f32 %v1796_v49, %v1794_v54  ;;  %v423_v62 = vsub.f32 %v1702_v39, %v384_v19  ;;  %v424_v16 = vsub.f32 %v1700_v4, %v384_v19 }
 0x125   : > { %v1804_v52 = vpop.eup %1220  ;;  %v522_v29 = vrot.slane %v521_v57, 2  ;;  %v425_v45 = vsub.f32 %v1713_v27, %v384_v19  ;;  %v426_v11 = vsub.f32 %v1761_v36, %v384_v19  ;;  %v402_v21 = vmax.f32 %v400_v28, %v401_v34 }
 0x126   : > { %v527_v32 = vadd.f32 %v1798_v35, %v526_v61  ;;  %v475_v40 = vmul.f32 1.442695, %v423_v62  ;;  %v477_v47 = vmul.f32 1.442695, %v424_v16  ;;  %v391_v59 = vmax.f32 %v389_v17, %v390_v58 }
 0x127   : > { %v523_v48 = vadd.f32 %v522_v29, %v521_v57  ;;  %v479_v12 = vmul.f32 1.442695, %v425_v45  ;;  %v481_v51 = vmul.f32 1.442695, %v426_v11  ;;  %v431_v56 = vsub.f32 %v1724_v44, %v402_v21 }
 0x128   : > { %v528_v39 = vadd.f32 %v1804_v52, %v527_v32  ;;  %1234 = vpow2.f32 %v475_v40  ;;  %v432_v4 = vsub.f32 %v1716_v41, %v402_v21  ;;  %v433_v34 = vsub.f32 %v1738_v42, %v402_v21 }
 0x129   : > { %v1812_v55 = vpop.eup %1222  ;;  %v524_v27 = vrot.slane %v523_v48, 1  ;;  %1236 = vpow2.f32 %v477_v47  ;;  %v491_v36 = vmul.f32 1.442695, %v431_v56  ;;  %v434_v61 = vsub.f32 %v1766_v8, %v402_v21 }
 0x12a   : > { %v1814_v28 = vpop.eup %1224  ;;  %v529_v19 = vrot.slane %v528_v39, 4  ;;  %1238 = vpow2.f32 %v479_v12  ;;  %v493_v58 = vmul.f32 1.442695, %v432_v4  ;;  %v392_v62 = vrot.slane %v391_v59, 1 }
 0x12b   : > { %v525_v57 = vadd.f32 %v524_v27, %v523_v48  ;;  %v535_v44 = vadd.f32 %v1814_v28, %v1812_v55  ;;  %1240 = vpow2.f32 %v481_v51  ;;  %v495_v8 = vmul.f32 1.442695, %v433_v34 }
 0x12c   : > { %v1227_v41 = vpop.eup %1226  ;;  %v530_v17 = vadd.f32 %v529_v19, %v528_v39  ;;  %1242 = vpow2.f32 %v491_v36  ;;  %v1834_v27 = vmax.f32 %v391_v59, %v392_v62 }
 0x12d   : > { %v1820_v16 = vpop.eup %1228  ;;  %v579_v29 = vmul.f32 %v1227_v41, %v1728_v60  ;;  %v580_v45 = vmul.f32 %v1227_v41, %v1730_v63  ;;  %v581_v42 = vmul.f32 %v1227_v41, %v1732_v3  ;;  %v582_v11 = vmul.f32 %v1227_v41, %v1736_v24 }
 0x12e   : > { %1244 = vrcp.f32 %v525_v57  ;;  %v531_v32 = vrot.slane %v530_v17, 2  ;;  %v536_v40 = vadd.f32 %v1820_v16, %v535_v44  ;;  %v1827_v21 = vpop.eup %1230  ;;  %v497_v24 = vmul.f32 1.442695, %v434_v61 }
 0x12f   : > { %v611_v47 = vmul.f32 %v579_v29, %v1529_v2  ;;  %v612_v48 = vmul.f32 %v580_v45, %v1539_v6  ;;  %v613_v12 = vmul.f32 %v581_v42, %v1559_v14  ;;  %v614_v60 = vmul.f32 %v582_v11, %v1583_v25 }
 0x130   : > { %v532_v63 = vadd.f32 %v531_v32, %v530_v17  ;;  %v537_v3 = vadd.f32 %v1827_v21, %v536_v40  ;;  %1246 = vpow2.f32 %v493_v58 }
 0x131   : > { %v1233_v51 = vpop.eup %1232  ;;  %v643_v56 = vadd.f32 %v612_v48, %v611_v47  ;;  %v715_v39 = vmul.f32 %v611_v47, %v611_v47  ;;  %v716_v4 = vmul.f32 %v612_v48, %v612_v48  ;;  %v717_v36 = vmul.f32 %v613_v12, %v613_v12 }
 0x132   : > { %v583_v2 = vmul.f32 %v1233_v51, %v1741_v15  ;;  %v584_v6 = vmul.f32 %v1233_v51, %v1745_v1  ;;  %v585_v14 = vmul.f32 %v1233_v51, %v1751_v43  ;;  %v718_v19 = vmul.f32 %v614_v60, %v614_v60 }
 0x133   : > { %v747_v25 = vadd.f32 %v716_v4, %v715_v39  ;;  %v586_v34 = vmul.f32 %v1233_v51, %v1757_v31  ;;  %v533_v57 = vrot.slane %v532_v63, 1  ;;  %v538_v59 = vrot.slane %v537_v3, 4 }
 0x134   : > { %v615_v44 = vmul.f32 %v583_v2, %v1521_v0  ;;  %v616_v61 = vmul.f32 %v584_v6, %v1536_v5  ;;  %v617_v41 = vmul.f32 %v585_v14, %v1556_v13  ;;  %v644_v58 = vadd.f32 %v643_v56, %v613_v12 }
 0x135   : > { %v1843_v17 = vpop.eup %1234  ;;  %v748_v15 = vadd.f32 %v747_v25, %v717_v36  ;;  %v618_v1 = vmul.f32 %v586_v34, %v1593_v30  ;;  %v534_v62 = vadd.f32 %v533_v57, %v532_v63  ;;  %v427_v0 = vsub.f32 %v1709_v23, %v1834_v27 }
 0x136   : > { %v1846_v43 = vpop.eup %1236  ;;  %v652_v29 = vadd.f32 %v616_v61, %v615_v44  ;;  %v719_v45 = vmul.f32 %v615_v44, %v615_v44  ;;  %v720_v31 = vmul.f32 %v616_v61, %v616_v61  ;;  %v721_v13 = vmul.f32 %v617_v41, %v617_v41 }
 0x137   : > { %v1850_v42 = vpop.eup %1238  ;;  %v749_v5 = vadd.f32 %v748_v15, %v718_v19  ;;  %1248 = vrcp.f32 %v534_v62  ;;  %v539_v11 = vadd.f32 %v538_v59, %v537_v3  ;;  %v544_v30 = vadd.f32 %v1846_v43, %v1843_v17 }
 0x138   : > { %v1852_v32 = vpop.eup %1240  ;;  %v653_v40 = vadd.f32 %v652_v29, %v617_v41  ;;  %v756_v47 = vadd.f32 %v720_v31, %v719_v45  ;;  %1250 = vpow2.f32 %v495_v8  ;;  %v1858_v12 = vadd.f32 %v644_v58, %v614_v60 }
 0x139   : > { %v1856_v48 = vpop.eup %1242  ;;  %v750_v63 = vrot.slane %v749_v5, 4  ;;  %v722_v23 = vmul.f32 %v618_v1, %v618_v1  ;;  %v540_v51 = vrot.slane %v539_v11, 2  ;;  %v545_v39 = vadd.f32 %v1850_v42, %v544_v30 }
 0x13a   : > { %v757_v56 = vadd.f32 %v756_v47, %v721_v13  ;;  %1252 = vpow2.f32 %v497_v24  ;;  %v428_v3 = vsub.f32 %v1707_v20, %v1834_v27  ;;  %v654_v2 = vadd.f32 %v653_v40, %v618_v1 }
 0x13b   : > { %v1245_v4 = vpop.eup %1244  ;;  %v1863_v36 = vadd.f32 %v750_v63, %v749_v5  ;;  %v541_v6 = vadd.f32 %v540_v51, %v539_v11  ;;  %v429_v8 = vsub.f32 %v1771_v53, %v1834_v27  ;;  %v546_v57 = vadd.f32 %v1852_v32, %v545_v39 }
 0x13c   : > { %v758_v60 = vadd.f32 %v757_v56, %v722_v23  ;;  %v587_v14 = vmul.f32 %v1245_v4, %v1778_v50  ;;  %v588_v19 = vmul.f32 %v1245_v4, %v1782_v26  ;;  %v589_v25 = vmul.f32 %v1245_v4, %v1787_v37 }
 0x13d   : > { %v1870_v34 = vpop.eup %1246  ;;  %v590_v24 = vmul.f32 %v1245_v4, %v1789_v7  ;;  %v542_v20 = vrot.slane %v541_v6, 1  ;;  %v483_v44 = vmul.f32 1.442695, %v427_v0  ;;  %v547_v58 = vrot.slane %v546_v57, 4 }
 0x13e   : > { %v759_v61 = vrot.slane %v758_v60, 4  ;;  %v619_v41 = vmul.f32 %v587_v14, %v1549_v10  ;;  %v620_v53 = vmul.f32 %v588_v19, %v1546_v9  ;;  %v621_v59 = vmul.f32 %v589_v25, %v1577_v22  ;;  %v2165_v19 = vld [vmem:[#allocation8_spill] sm:$0xff] }
 0x13f   : > { %v622_v50 = vmul.f32 %v590_v24, %v1607_v38  ;;  %v543_v26 = vadd.f32 %v542_v20, %v541_v6  ;;  %v430_v37 = vsub.f32 %v1774_v33, %v1834_v27  ;;  %v562_v62 = vadd.f32 %v1870_v34, %v1856_v48 }
 0x140   : > { %v1880_v15 = vadd.f32 %v759_v61, %v758_v60  ;;  %v723_v7 = vmul.f32 %v619_v41, %v619_v41  ;;  %v724_v1 = vmul.f32 %v620_v53, %v620_v53  ;;  %v725_v29 = vmul.f32 %v621_v59, %v621_v59 }
 0x141   : > { %1254 = vrcp.f32 %v543_v26  ;;  %v548_v10 = vadd.f32 %v547_v58, %v546_v57  ;;  %v485_v9 = vmul.f32 1.442695, %v428_v3  ;;  %v726_v45 = vmul.f32 %v622_v50, %v622_v50 }
 0x142   : > { %v765_v22 = vadd.f32 %v724_v1, %v723_v7  ;;  %1256 = vpow2.f32 %v483_v44  ;;  %v487_v38 = vmul.f32 1.442695, %v429_v8  ;;  %v489_v0 = vmul.f32 1.442695, %v430_v37  ;;  %v2166_v44 = vld [vmem:[#allocation9_spill] sm:$0xff] }
 0x143   : > { %v549_v31 = vrot.slane %v548_v10, 2  ;;  %1258 = vpow2.f32 %v485_v9  ;;  %v646_v33 = vrot.slane %v1858_v12, 4  ;;  %v655_v13 = vrot.slane %v654_v2, 4 }
 0x144   : > { %v1249_v27 = vpop.eup %1248  ;;  %v766_v5 = vadd.f32 %v765_v22, %v725_v29  ;;  %1260 = vpow2.f32 %v487_v38  ;;  %v661_v11 = vadd.f32 %v620_v53, %v619_v41  ;;  %v752_v60 = vrot.slane %v1863_v36, 2 }
 0x145   : > { %v1885_v40 = vpop.eup %1250  ;;  %v594_v47 = vmul.f32 %v1249_v27, %v1804_v52  ;;  %v550_v30 = vadd.f32 %v549_v31, %v548_v10  ;;  %1262 = vpow2.f32 %v489_v0  ;;  %v591_v63 = vmul.f32 %v1249_v27, %v1794_v54 }
 0x146   : > { %v767_v23 = vadd.f32 %v766_v5, %v726_v45  ;;  %v563_v51 = vadd.f32 %v1885_v40, %v562_v62  ;;  %v592_v56 = vmul.f32 %v1249_v27, %v1796_v49  ;;  %v593_v39 = vmul.f32 %v1249_v27, %v1798_v35 }
 0x147   : > { %v1892_v3 = vpop.eup %1252  ;;  %v626_v4 = vmul.f32 %v594_v47, %v1619_v46  ;;  %v551_v6 = vrot.slane %v550_v30, 1  ;;  %v623_v8 = vmul.f32 %v591_v63, %v1569_v18  ;;  %v647_v52 = vadd.f32 %v646_v33, %v1858_v12 }
 0x148   : > { %v768_v14 = vrot.slane %v767_v23, 4  ;;  %v564_v54 = vadd.f32 %v1892_v3, %v563_v51  ;;  %v624_v25 = vmul.f32 %v592_v56, %v2165_v19  ;;  %v761_v49 = vrot.slane %v1880_v15, 2 }
 0x149   : > { %v552_v24 = vadd.f32 %v551_v6, %v550_v30  ;;  %v648_v35 = vrot.slane %v647_v52, 2  ;;  %v656_v20 = vadd.f32 %v655_v13, %v654_v2  ;;  %v625_v46 = vmul.f32 %v593_v39, %v2166_v44  ;;  %v2167_v39 = vld [vmem:[#allocation10_spill] sm:$0xff]  ;;  %v2168_v6 = vld [vmem:[#allocation11_spill] sm:$0xff] }
 0x14a   : > { %v565_v57 = vrot.slane %v564_v54, 4  ;;  %v662_v61 = vadd.f32 %v661_v11, %v621_v59  ;;  %v670_v41 = vadd.f32 %v624_v25, %v623_v8  ;;  %v1902_v18 = vmul.f32 %v626_v4, %v626_v4 }
 0x14b   : > { %1264 = vrcp.f32 %v552_v24  ;;  %v649_v12 = vadd.f32 %v648_v35, %v647_v52  ;;  %v657_v53 = vrot.slane %v656_v20, 2  ;;  %v1904_v26 = vadd.f32 %v768_v14, %v767_v23 }
 0x14c   : > { %v566_v58 = vadd.f32 %v565_v57, %v564_v54  ;;  %v663_v37 = vadd.f32 %v662_v61, %v622_v50  ;;  %v671_v7 = vadd.f32 %v670_v41, %v625_v46  ;;  %v727_v29 = vmul.f32 %v623_v8, %v623_v8 }
 0x14d   : > { %v650_v1 = vrot.slane %v649_v12, 1  ;;  %v658_v62 = vadd.f32 %v657_v53, %v656_v20  ;;  %v728_v10 = vmul.f32 %v624_v25, %v624_v25  ;;  %v1906_v22 = vmul.f32 %v625_v46, %v625_v46 }
 0x14e   : > { %v1255_v2 = vpop.eup %1254  ;;  %v567_v9 = vrot.slane %v566_v58, 2  ;;  %v664_v45 = vrot.slane %v663_v37, 4  ;;  %v672_v59 = vadd.f32 %v671_v7, %v626_v4  ;;  %v1917_v47 = vadd.f32 %v752_v60, %v1863_v36 }
 0x14f   : > { %v1908_v38 = vpop.eup %1256  ;;  %v598_v31 = vmul.f32 %v1255_v2, %v1827_v21  ;;  %v595_v0 = vmul.f32 %v1255_v2, %v1812_v55  ;;  %v596_v50 = vmul.f32 %v1255_v2, %v1814_v28  ;;  %v597_v33 = vmul.f32 %v1255_v2, %v1820_v16  ;;  %v1286_v21 = vld [vmem:[%s1514_s6 + $0x80] sm:$0xff]  ;;  %v1287_v55 = vld [vmem:[%s1514_s6 + $0x88] sm:$0xff] }
 0x150   : > { %v1914_v27 = vpop.eup %1258  ;;  %v568_v5 = vadd.f32 %v567_v9, %v566_v58  ;;  %v659_v13 = vrot.slane %v658_v62, 1  ;;  %v665_v11 = vadd.f32 %v664_v45, %v663_v37  ;;  %v762_v28 = vadd.f32 %v761_v49, %v1880_v15 }
 0x151   : > { %v1919_v30 = vpop.eup %1260  ;;  %v553_v63 = vadd.f32 %v1914_v27, %v1908_v38  ;;  %v627_v23 = vmul.f32 %v1286_v21, %v595_v0  ;;  %v628_v51 = vmul.f32 %v1287_v55, %v596_v50  ;;  %v629_v4 = vmul.f32 %v597_v33, %v2167_v39  ;;  %v1289_v21 = vld [vmem:[%s1514_s6 + $0xa8] sm:$0xff]  ;;  %v1291_v55 = vld [vmem:[%s1514_s6 + $0xb0] sm:$0xff] }
 0x152   : > { %v1926_v16 = vpop.eup %1262  ;;  %v569_v56 = vrot.slane %v568_v5, 1  ;;  %v630_v8 = vmul.f32 %v598_v31, %v2168_v6  ;;  %v666_v36 = vrot.slane %v665_v11, 2  ;;  %v1931_v60 = vadd.f32 %v650_v1, %v649_v12 }
 0x153   : > { %v554_v52 = vadd.f32 %v1919_v30, %v553_v63  ;;  %v673_v14 = vrot.slane %v672_v59, 4  ;;  %v679_v54 = vadd.f32 %v628_v51, %v627_v23  ;;  %v1933_v25 = vadd.f32 %v659_v13, %v658_v62 }
 0x154   : > { %v570_v19 = vadd.f32 %v569_v56, %v568_v5  ;;  %v667_v24 = vadd.f32 %v666_v36, %v665_v11  ;;  %v731_v35 = vmul.f32 %v627_v23, %v627_v23  ;;  %v732_v57 = vmul.f32 %v628_v51, %v628_v51  ;;  %v1288_v11 = vld [vmem:[%s1514_s6 + $0xa0] sm:$0xff] }
 0x155   : > { %v555_v15 = vadd.f32 %v1926_v16, %v554_v52  ;;  %v674_v49 = vadd.f32 %v673_v14, %v672_v59  ;;  %v680_v20 = vadd.f32 %v679_v54, %v629_v4  ;;  %v733_v46 = vmul.f32 %v629_v4, %v629_v4 }
 0x156   : > { %1266 = vrcp.f32 %v570_v19  ;;  %v668_v44 = vrot.slane %v667_v24, 1  ;;  %v1936_v61 = vmul.f32 %v630_v8, %v630_v8  ;;  %v770_v58 = vrot.slane %v1904_v26, 2 }
 0x157   : > { %v556_v41 = vrot.slane %v555_v15, 4  ;;  %v675_v12 = vrot.slane %v674_v49, 2  ;;  %v681_v53 = vadd.f32 %v680_v20, %v630_v8  ;;  %v754_v1 = vrot.slane %v1917_v47, 1 }
 0x158   : > { %v1265_v37 = vpop.eup %1264  ;;  %v1939_v7 = vadd.f32 %v668_v44, %v667_v24  ;;  %v763_v62 = vrot.slane %v762_v28, 1  ;;  %v774_v2 = vadd.f32 %v728_v10, %v727_v29  ;;  %v771_v5 = vadd.f32 %v770_v58, %v1904_v26  ;;  %v1290_v29 = vld [vmem:[%s1514_s6 + $0xb8] sm:$0xff] }
 0x159   : > { %v602_v9 = vmul.f32 %v1265_v37, %v1852_v32  ;;  %v557_v45 = vadd.f32 %v556_v41, %v555_v15  ;;  %v599_v59 = vmul.f32 %v1265_v37, %v1843_v17  ;;  %v600_v31 = vmul.f32 %v1265_v37, %v1846_v43 }
 0x15a   : > { %v601_v0 = vmul.f32 %v1265_v37, %v1850_v42  ;;  %v676_v50 = vadd.f32 %v675_v12, %v674_v49  ;;  %v682_v33 = vrot.slane %v681_v53, 4  ;;  %v772_v17 = vrot.slane %v771_v5, 1 }
 0x15b   : > { %v558_v13 = vrot.slane %v557_v45, 2  ;;  %v631_v63 = vmul.f32 %v1288_v11, %v599_v59  ;;  %v632_v23 = vmul.f32 %v1289_v21, %v600_v31  ;;  %v634_v10 = vmul.f32 %v1290_v29, %v602_v9 }
 0x15c   : > { %v633_v32 = vmul.f32 %v1291_v55, %v601_v0  ;;  %v677_v51 = vrot.slane %v676_v50, 1  ;;  %v683_v56 = vadd.f32 %v682_v33, %v681_v53  ;;  %v1954_v26 = vadd.f32 %v754_v1, %v1917_v47  ;;  %v1292_v0 = vld [vmem:[%s1514_s6 + $0xe0] sm:$0xff]  ;;  %v1293_v33 = vld [vmem:[%s1514_s6 + $0xe8] sm:$0xff] }
 0x15d   : > { %v559_v39 = vadd.f32 %v558_v13, %v557_v45  ;;  %v688_v43 = vadd.f32 %v632_v23, %v631_v63  ;;  %v735_v4 = vmul.f32 %v631_v63, %v631_v63  ;;  %v736_v42 = vmul.f32 %v632_v23, %v632_v23  ;;  %v1294_v13 = vld [vmem:[%s1514_s6 + $0xf0] sm:$0xff] }
 0x15e   : > { %v1951_v6 = vadd.f32 %v677_v51, %v676_v50  ;;  %v684_v8 = vrot.slane %v683_v56, 2  ;;  %v1956_v36 = vadd.f32 %v763_v62, %v762_v28  ;;  %v737_v54 = vmul.f32 %v633_v32, %v633_v32 }
 0x15f   : > { %v560_v52 = vrot.slane %v559_v39, 1  ;;  %v689_v14 = vadd.f32 %v688_v43, %v633_v32  ;;  %v775_v19 = vadd.f32 %v774_v2, %v1906_v22  ;;  %v738_v15 = vmul.f32 %v634_v10, %v634_v10 }
 0x160   : > { %v685_v24 = vadd.f32 %v684_v8, %v683_v56  ;;  %v783_v49 = vadd.f32 %v732_v57, %v731_v35  ;;  %v792_v20 = vadd.f32 %v736_v42, %v735_v4  ;;  %v1959_v12 = vadd.f32 %v772_v17, %v771_v5 }
 0x161   : > { %v561_v44 = vadd.f32 %v560_v52, %v559_v39  ;;  %v690_v41 = vadd.f32 %v689_v14, %v634_v10  ;;  %v776_v53 = vadd.f32 %v775_v19, %v1902_v18  ;;  %v1963_v28 = vmul.f32 0.03125, %v1931_v60 }
 0x162   : > { %v686_v58 = vrot.slane %v685_v24, 1  ;;  %v784_v47 = vadd.f32 %v783_v49, %v733_v46  ;;  %v1966_v37 = vmul.f32 0.03125, %v1933_v25  ;;  %v793_v1 = vadd.f32 %v792_v20, %v737_v54 }
 0x163   : > { %v1267_v22 = vpop.eup %1266  ;;  %1268 = vrcp.f32 %v561_v44  ;;  %v691_v35 = vrot.slane %v690_v41, 4  ;;  %v777_v57 = vrot.slane %v776_v53, 4  ;;  %v1974_v31 = vmul.f32 0.03125, %v1939_v7 }
 0x164   : > { %v607_v62 = vmul.f32 %v1267_v22, %v1856_v48  ;;  %v608_v18 = vmul.f32 %v1267_v22, %v1870_v34  ;;  %v609_v46 = vmul.f32 %v1267_v22, %v1885_v40  ;;  %v610_v2 = vmul.f32 %v1267_v22, %v1892_v3  ;;  %v1295_v48 = vld [vmem:[%s1514_s6 + $0xf8] sm:$0xff] }
 0x165   : > { %v692_v9 = vadd.f32 %v691_v35, %v690_v41  ;;  %v778_v45 = vadd.f32 %v777_v57, %v776_v53  ;;  %v785_v59 = vadd.f32 %v784_v47, %v1936_v61  ;;  %v794_v23 = vadd.f32 %v793_v1, %v738_v15 }
 0x166   : > { %v639_v50 = vmul.f32 %v1292_v0, %v607_v62  ;;  %v640_v5 = vmul.f32 %v1293_v33, %v608_v18  ;;  %v641_v11 = vmul.f32 %v1294_v13, %v609_v46  ;;  %v642_v63 = vmul.f32 %v1295_v48, %v610_v2 }
 0x167   : > { %v693_v34 = vrot.slane %v692_v9, 2  ;;  %v779_v21 = vrot.slane %v778_v45, 2  ;;  %v786_v40 = vrot.slane %v785_v59, 4  ;;  %v1980_v3 = vadd.f32 %v686_v58, %v685_v24 }
 0x168   : > { %v706_v29 = vadd.f32 %v640_v5, %v639_v50  ;;  %v743_v10 = vmul.f32 %v639_v50, %v639_v50  ;;  %v744_v61 = vmul.f32 %v640_v5, %v640_v5  ;;  %v823_v56 = vmul.f32 0.03125, %v1951_v6 }
 0x169   : > { %v694_v55 = vadd.f32 %v693_v34, %v692_v9  ;;  %v780_v32 = vadd.f32 %v779_v21, %v778_v45  ;;  %v787_v51 = vadd.f32 %v786_v40, %v785_v59  ;;  %v745_v39 = vmul.f32 %v641_v11, %v641_v11  ;;  %v1297_v21 = vld [vmem:[%s1514_s6 + $0xc8] sm:$0xff] }
 0x16a   : > { %v707_v17 = vadd.f32 %v706_v29, %v641_v11  ;;  %v795_v43 = vrot.slane %v794_v23, 4  ;;  %v810_v4 = vadd.f32 %v744_v61, %v743_v10  ;;  %v746_v8 = vmul.f32 %v642_v63, %v642_v63 }
 0x16b   : > { %v695_v42 = vrot.slane %v694_v55, 1  ;;  %v781_v52 = vrot.slane %v780_v32, 1  ;;  %v788_v14 = vrot.slane %v787_v51, 2  ;;  %v824_v15 = vmul.f32 0.03125, %v1980_v3 }
 0x16c   : > { %v708_v54 = vadd.f32 %v707_v17, %v642_v63  ;;  %v796_v19 = vadd.f32 %v795_v43, %v794_v23  ;;  %v811_v24 = vadd.f32 %v810_v4, %v745_v39  ;;  %v828_v44 = vmul.f32 32.0, %v1963_v28  ;;  %v1296_v63 = vld [vmem:[%s1514_s6 + $0xc0] sm:$0xff]  ;;  %v1298_v23 = vld [vmem:[%s1514_s6 + $0xd0] sm:$0xff] }
 0x16d   : > { %v1984_v49 = vadd.f32 %v695_v42, %v694_v55  ;;  %v789_v20 = vadd.f32 %v788_v14, %v787_v51  ;;  %v829_v41 = vmul.f32 32.0, %v1966_v37  ;;  %v1988_v58 = vadd.f32 %v781_v52, %v780_v32 }
 0x16e   : > { %v709_v53 = vrot.slane %v708_v54, 4  ;;  %v797_v47 = vrot.slane %v796_v19, 2  ;;  %v812_v22 = vadd.f32 %v811_v24, %v746_v8  ;;  %v830_v1 = vmul.f32 32.0, %v1974_v31 }
 0x16f   : > { %v790_v35 = vrot.slane %v789_v20, 1  ;;  %v825_v57 = vmul.f32 0.03125, %v1984_v49  ;;  %v831_v62 = vmul.f32 32.0, %v823_v56  ;;  %v832_v45 = vmul.f32 32.0, %v824_v15 }
 0x170   : > { %v1269_v18 = vpop.eup %1268  ;;  %v710_v46 = vadd.f32 %v709_v53, %v708_v54  ;;  %v798_v2 = vadd.f32 %v797_v47, %v796_v19  ;;  %v813_v9 = vrot.slane %v812_v22, 4  ;;  %v836_v11 = vmul.f32 %v828_v44, %v1963_v28 }
 0x171   : > { %v603_v59 = vmul.f32 %v1269_v18, %v1908_v38  ;;  %v604_v0 = vmul.f32 %v1269_v18, %v1914_v27  ;;  %v605_v50 = vmul.f32 %v1269_v18, %v1919_v30  ;;  %v606_v33 = vmul.f32 %v1269_v18, %v1926_v16  ;;  %v1299_v38 = vld [vmem:[%s1514_s6 + $0xd8] sm:$0xff] }
 0x172   : > { %v711_v5 = vrot.slane %v710_v46, 2  ;;  %v814_v13 = vadd.f32 %v813_v9, %v812_v22  ;;  %v837_v48 = vmul.f32 %v829_v41, %v1966_v37  ;;  %v791_v10 = vadd.f32 %v790_v35, %v789_v20 }
 0x173   : > { %v635_v34 = vmul.f32 %v1296_v63, %v603_v59  ;;  %v636_v40 = vmul.f32 %v1297_v21, %v604_v0  ;;  %v637_v29 = vmul.f32 %v1298_v23, %v605_v50  ;;  %v638_v61 = vmul.f32 %v1299_v38, %v606_v33 }
 0x174   : > { %v712_v27 = vadd.f32 %v711_v5, %v710_v46  ;;  %v815_v55 = vrot.slane %v814_v13, 2  ;;  %v833_v30 = vmul.f32 32.0, %v825_v57  ;;  %v799_v17 = vrot.slane %v798_v2, 1 }
 0x175   : > { %v697_v32 = vadd.f32 %v636_v40, %v635_v34  ;;  %v739_v16 = vmul.f32 %v635_v34, %v635_v34  ;;  %v740_v51 = vmul.f32 %v636_v40, %v636_v40  ;;  %v741_v28 = vmul.f32 %v637_v29, %v637_v29 }
 0x176   : > { %v713_v39 = vrot.slane %v712_v27, 1  ;;  %v816_v43 = vadd.f32 %v815_v55, %v814_v13  ;;  %v838_v37 = vmul.f32 %v830_v1, %v1974_v31  ;;  %v839_v8 = vmul.f32 %v831_v62, %v823_v56 }
 0x177   : > { %v698_v4 = vadd.f32 %v697_v32, %v637_v29  ;;  %v801_v42 = vadd.f32 %v740_v51, %v739_v16  ;;  %v840_v52 = vmul.f32 %v832_v45, %v824_v15  ;;  %v742_v54 = vmul.f32 %v638_v61, %v638_v61 }
 0x178   : > { %v2003_v14 = vadd.f32 %v713_v39, %v712_v27  ;;  %v841_v19 = vmul.f32 %v833_v30, %v825_v57  ;;  %v844_v24 = vsub.f32 %v1954_v26, %v836_v11  ;;  %v845_v41 = vsub.f32 %v1956_v36, %v837_v48 }
 0x179   : > { %v699_v20 = vadd.f32 %v698_v4, %v638_v61  ;;  %v802_v44 = vadd.f32 %v801_v42, %v741_v28  ;;  %v846_v53 = vsub.f32 %v1959_v12, %v838_v37  ;;  %v800_v47 = vadd.f32 %v799_v17, %v798_v2 }
 0x17a   : > { %v817_v22 = vrot.slane %v816_v43, 1  ;;  %v827_v31 = vmul.f32 0.03125, %v2003_v14  ;;  %v847_v35 = vsub.f32 %v1988_v58, %v839_v8  ;;  %v848_v1 = vsub.f32 %v791_v10, %v840_v52 }
 0x17b   : > { %v700_v56 = vrot.slane %v699_v20, 4  ;;  %v803_v15 = vadd.f32 %v802_v44, %v742_v54  ;;  %v853_v62 = vmul.f32 0.032258064, %v844_v24  ;;  %v849_v57 = vsub.f32 %v800_v47, %v841_v19 }
 0x17c   : > { %v835_v18 = vmul.f32 32.0, %v827_v31  ;;  %v854_v46 = vmul.f32 0.032258064, %v845_v41  ;;  %v855_v45 = vmul.f32 0.032258064, %v846_v53  ;;  %v818_v59 = vadd.f32 %v817_v22, %v816_v43 }
 0x17d   : > { %v701_v26 = vadd.f32 %v700_v56, %v699_v20  ;;  %v804_v9 = vrot.slane %v803_v15, 4  ;;  %v856_v0 = vmul.f32 0.032258064, %v847_v35  ;;  %v857_v50 = vmul.f32 0.032258064, %v848_v1 }
 0x17e   : > { %v843_v36 = vmul.f32 %v835_v18, %v827_v31  ;;  %v861_v33 = vmax.f32 %v853_v62, 0.0  ;;  %v858_v13 = vmul.f32 0.032258064, %v849_v57  ;;  %v862_v58 = vmax.f32 %v854_v46, 0.0 }
 0x17f   : > { %v702_v12 = vrot.slane %v701_v26, 2  ;;  %v805_v2 = vadd.f32 %v804_v9, %v803_v15  ;;  %v863_v63 = vmax.f32 %v855_v45, 0.0  ;;  %v864_v21 = vmax.f32 %v856_v0, 0.0 }
 0x180   : > { %v851_v5 = vsub.f32 %v818_v59, %v843_v36  ;;  %v865_v29 = vmax.f32 %v857_v50, 0.0  ;;  %v2010_v10 = vadd.f32 1e-10, %v861_v33  ;;  %v866_v38 = vmax.f32 %v858_v13, 0.0 }
 0x181   : > { %v703_v11 = vadd.f32 %v702_v12, %v701_v26  ;;  %v806_v48 = vrot.slane %v805_v2, 2  ;;  %v2012_v61 = vadd.f32 1e-10, %v862_v58  ;;  %v2014_v55 = vadd.f32 1e-10, %v863_v63 }
 0x182   : > { %v860_v34 = vmul.f32 0.032258064, %v851_v5  ;;  %v2016_v32 = vadd.f32 1e-10, %v864_v21  ;;  %v2018_v17 = vadd.f32 1e-10, %v865_v29  ;;  %1270 = vrsqrt.f32 %v2010_v10 }
 0x183   : > { %v704_v40 = vrot.slane %v703_v11, 1  ;;  %v807_v23 = vadd.f32 %v806_v48, %v805_v2  ;;  %v2021_v39 = vadd.f32 1e-10, %v866_v38  ;;  %1272 = vrsqrt.f32 %v2012_v61 }
 0x184   : > { %v868_v30 = vmax.f32 %v860_v34, 0.0  ;;  %1274 = vrsqrt.f32 %v2014_v55  ;;  %v942_v42 = vsel %vm941_vm0, %v1933_v25, %v1931_v60  ;;  %vm879_vm7 = vcmp.eq.f32.partialorder %v2010_v10, inf }
 0x185   : > { %v705_v27 = vadd.f32 %v704_v40, %v703_v11  ;;  %v808_v16 = vrot.slane %v807_v23, 1  ;;  %1276 = vrsqrt.f32 %v2016_v32  ;;  %v944_v8 = vsel %vm943_vm1, %v1939_v7, %v942_v42 }
 0x186   : > { %v2025_v43 = vadd.f32 1e-10, %v868_v30  ;;  %1278 = vrsqrt.f32 %v2018_v17  ;;  %v946_v54 = vsel %vm945_vm2, %v1951_v6, %v944_v8  ;;  %vm881_vm8 = vcmp.eq.f32.partialorder %v2010_v10, 0.0 }
 0x187   : > { %v826_v51 = vmul.f32 0.03125, %v705_v27  ;;  %v809_v37 = vadd.f32 %v808_v16, %v807_v23  ;;  %1280 = vrsqrt.f32 %v2021_v39  ;;  %v948_v19 = vsel %vm947_vm3, %v1980_v3, %v946_v54 }
 0x188   : > { %1282 = vrsqrt.f32 %v2025_v43  ;;  %v950_v60 = vsel %vm949_vm4, %v1984_v49, %v948_v19  ;;  %v882_v35 = vand.u32 2147483648, %v2010_v10  ;;  %vm886_vm9 = vcmp.eq.f32.partialorder %v2012_v61, inf }
 0x189   : > { %v834_v28 = vmul.f32 32.0, %v826_v51  ;;  %v952_v25 = vsel %vm951_vm5, %v705_v27, %v950_v60  ;;  %vm888_vm10 = vcmp.eq.f32.partialorder %v2012_v61, 0.0  ;;  %v889_v1 = vand.u32 2147483648, %v2012_v61 }
 0x18a   : > { %v954_v7 = vsel %vm953_vm6, %v2003_v14, %v952_v25  ;;  %vm893_vm11 = vcmp.eq.f32.partialorder %v2014_v55, inf  ;;  %vm895_vm12 = vcmp.eq.f32.partialorder %v2014_v55, 0.0  ;;  %v896_v26 = vand.u32 2147483648, %v2014_v55 }
 0x18b   : > { %v842_v4 = vmul.f32 %v834_v28, %v826_v51  ;;  %956 = vst [vmem:[%s2046_s3] sm:$0xff] %v954_v7  ;;  %vm900_vm13 = vcmp.eq.f32.partialorder %v2016_v32, inf  ;;  %vm902_vm14 = vcmp.eq.f32.partialorder %v2016_v32, 0.0  ;;  %vm907_vm15 = vcmp.eq.f32.partialorder %v2018_v17, inf }
 0x18c   : > { %v903_v0 = vand.u32 2147483648, %v2016_v32  ;;  %v910_v50 = vand.u32 2147483648, %v2018_v17  ;;  %v917_v58 = vand.u32 2147483648, %v2021_v39  ;;  %v931_v23 = vand.u32 2147483648, %v2025_v43 }
 0x18d   : > { %v850_v52 = vsub.f32 %v809_v37, %v842_v4 }
 0x18f   : > { %v859_v24 = vmul.f32 0.032258064, %v850_v52  ;;  %v1271_v44 = vpop.eup %1270 }
 0x190   : > { %v1273_v41 = vpop.eup %1272  ;;  %v878_v31 = vmul.f32 %v1271_v44, %v2010_v10 }
 0x191   : > { %v867_v20 = vmax.f32 %v859_v24, 0.0  ;;  %v1275_v3 = vpop.eup %1274  ;;  %v885_v49 = vmul.f32 %v1273_v41, %v2012_v61 }
 0x192   : > { %v1277_v53 = vpop.eup %1276  ;;  %v892_v14 = vmul.f32 %v1275_v3, %v2014_v55  ;;  %v880_v9 = vsel %vm879_vm7, %v2010_v10, %v878_v31  ;;  %vm928_vm7 = vcmp.eq.f32.partialorder %v2025_v43, inf }
 0x193   : > { %v2049_v6 = vadd.f32 1e-10, %v867_v20  ;;  %v1279_v47 = vpop.eup %1278  ;;  %v899_v56 = vmul.f32 %v1277_v53, %v2016_v32  ;;  %v887_v18 = vsel %vm886_vm9, %v2012_v61, %v885_v49  ;;  %vm914_vm9 = vcmp.eq.f32.partialorder %v2021_v39, inf }
 0x194   : > { %v1281_v22 = vpop.eup %1280  ;;  %v906_v62 = vmul.f32 %v1279_v47, %v2018_v17  ;;  %v894_v46 = vsel %vm893_vm11, %v2014_v55, %v892_v14  ;;  %v890_v36 = vsel %vm888_vm10, %v889_v1, %v887_v18  ;;  %vm909_vm11 = vcmp.eq.f32.partialorder %v2018_v17, 0.0 }
 0x195   : > { %1284 = vrsqrt.f32 %v2049_v6  ;;  %v1283_v15 = vpop.eup %1282  ;;  %v913_v57 = vmul.f32 %v1281_v22, %v2021_v39  ;;  %v901_v45 = vsel %vm900_vm13, %v2016_v32, %v899_v56  ;;  %v897_v2 = vsel %vm895_vm12, %v896_v26, %v894_v46 }
 0x196   : > { %v927_v59 = vmul.f32 %v1283_v15, %v2025_v43  ;;  %v908_v12 = vsel %vm907_vm15, %v2018_v17, %v906_v62  ;;  %v883_v5 = vsel %vm881_vm8, %v882_v35, %v880_v9  ;;  %v904_v13 = vsel %vm902_vm14, %v903_v0, %v901_v45 }
 0x197   : > { %v915_v33 = vsel %vm914_vm9, %v2021_v39, %v913_v57  ;;  %v911_v48 = vsel %vm909_vm11, %v910_v50, %v908_v12  ;;  %vm916_vm10 = vcmp.eq.f32.partialorder %v2021_v39, 0.0  ;;  %v965_v34 = vsel %vm941_vm0, %v890_v36, %v883_v5 }
 0x198   : > { %v929_v63 = vsel %vm928_vm7, %v2025_v43, %v927_v59  ;;  %v918_v21 = vsel %vm916_vm10, %v917_v58, %v915_v33  ;;  %v966_v29 = vsel %vm943_vm1, %v897_v2, %v965_v34  ;;  %vm921_vm8 = vcmp.eq.f32.partialorder %v2049_v6, inf }
 0x199   : > { %v924_v10 = vand.u32 2147483648, %v2049_v6  ;;  %vm930_vm12 = vcmp.eq.f32.partialorder %v2025_v43, 0.0  ;;  %v967_v38 = vsel %vm945_vm2, %v904_v13, %v966_v29  ;;  %vm923_vm0 = vcmp.eq.f32.partialorder %v2049_v6, 0.0 }
 0x19a   : > { %v932_v27 = vsel %vm930_vm12, %v931_v23, %v929_v63  ;;  %v968_v55 = vsel %vm947_vm3, %v911_v48, %v967_v38 }
 0x19b   : > { %v969_v32 = vsel %vm949_vm4, %v918_v21, %v968_v55 }
 0x1a2   : > { %v1285_v11 = vpop.eup %1284 }
 0x1a3   : > { %v920_v40 = vmul.f32 %v1285_v11, %v2049_v6 }
 0x1a5   : > { %v922_v61 = vsel %vm921_vm8, %v2049_v6, %v920_v40 }
 0x1a6   : > { %v925_v30 = vsel %vm923_vm0, %v924_v10, %v922_v61 }
 0x1a7   : > { %v970_v16 = vsel %vm951_vm5, %v925_v30, %v969_v32 }
 0x1a8   : > { %v971_v51 = vsel %vm953_vm6, %v932_v27, %v970_v16 }
 0x1a9   : > { %973 = vst [vmem:[%s2046_s3 + $0x8] sm:$0xff] %v971_v51 }
 0x1aa   : > { %1341 = shalt.err (!%p1338_p10)
}
 0x1ab   : > { %s1342_s25 = scalar_lea.hbm %s2107_s16, 256  ;;  %s1346_s29 = scalar_lea.hbm %s2148_s2, 512 }
 0x1ac   : > { %p1343_p0 = scmp.ne.s32.totalorder %s2107_s16, %s1342_s25  ;;  %p1347_p1 = scmp.lt.s32.totalorder %s2107_s16, %s2148_s2 }
 0x1ad   : > { %p1348_p3 = scmp.lt.s32.totalorder %s1346_s29, %s1342_s25 }
 0x1ae   : > { %p1344_p2 = pnand %p1343_p0, %p2169_p12 }
 0x1af   : > { %p1349_p6 = por %p1348_p3, %p1347_p1 }
 0x1b0   : > { %p1345_p9 = pneg %p1344_p2 }
 0x1b2   : > { %p1350_p11 = pnand %p1349_p6, %p1345_p9 }
 0x1b4   : > { %1353 = shalt.err (!%p1350_p11)
}
 0x1b5   : > { %1080 = dma.vmem_to_hbm [thread:$0]  (%p2169_p12), %s990_s7, 256, %s2107_s16, %s975_s13  }
 0x1b6 PF: > { %s1001_s28 = sand.u32 1, %s1380_s9   ;;  %p2170_p13 = scmp.ne.s32.totalorder %s2158_s22, 0 }
 0x1b7   : > { %p2171_p4 = scmp.ge.s32.totalorder %s1392_s12, 2  ;;  %s1002_s30 = scalar_lea.sflag [#allocation4], %s1001_s28 }
 0x1b9   : > { %p1087_p5 = pnand %p2171_p4, %p2170_p13 }
 0x1bb   : > { %p1088_p7 = pneg %p1087_p5 }
 0x1bd   : > { %1375 = dma.done.wait (%p1088_p7), %s1002_s30, 256  }
 0x1be   : > { %1377 = vsyncadd (%p1088_p7), %s1002_s30, 4294967040  ;;  %p15_p8 = scmp.ge.s32.totalorder %s1438_s15, 4   ;;  %s2172_s9 = smov %s1384_s10 }
 0x1bf   : > { %s2173_s10 = smov %s1388_s11  ;;  %s2174_s11 = smov %s1450_s18 }
 0x1c0   : > { %s2175_s12 = smov %s1438_s15  ;;  %17 = sbr.rel (!%p15_p8) target bundleno = 5 (0x5), region = 73 }
 0x1c5   :  { %1007 = vsyncpa [#allocation3], 1 }
 0x1c6   :  { %1009 = vsyncpa [#allocation3 + $0x1], 1 }
 0x1c7   :  { %1010 = vsyncpa [#allocation4], 1 }
 0x1c8   :  { %1012 = vsyncpa [#allocation4 + $0x1], 1 }

</bundles_post_ra>
